<compile_context>
chip_gen: v7x
topology: tpu7x:2x2x1
jax: 0.10.0
libtpu: 0.0.40
codegen_flags: <defaults>
</compile_context>

<pallas_src>
import functools

import jax
import jax.numpy as jnp
from jax.experimental import pallas as pl
from jax.experimental.pallas import tpu as pltpu


def _softlabel_ce_kernel(weights, total_b, outputs_ref, targets_ref,
                         partial_ref):
    """weights: static tuple of floats; total_b: static global batch size."""
    x = outputs_ref[...]                                  # (TB, C) native dtype
    TB, C = x.shape

    # Row-wise max in the native dtype (exact), then a numerically stable
    # logsumexp with only (x - m) promoted to f32 (exp / sum / log stay f32).
    m = jnp.max(x, axis=1, keepdims=True)                 # (TB, 1) native
    d = (x - m).astype(jnp.float32)                       # (TB, C) f32
    lse = jnp.log(jnp.sum(jnp.exp(d), axis=1, keepdims=True))   # (TB, 1) f32

    # "Gather" x[row, idx_k] with a lane-iota mask + lane reduction.  The sum
    # is exact in the native dtype (each row adds exactly one logit plus
    # zeros).  The scalar weight is applied AFTER the reduction -- K tiny
    # (TB, 1) muls, not K full-tile FMAs.  Duplicate indices across the K
    # label sets add, exactly like the PyTorch `target += w * tmp` loop.
    cls = jax.lax.broadcasted_iota(jnp.int32, (TB, C), 1)
    idx = targets_ref[...]                                # (TB, K) int32
    gathered = jnp.zeros((TB, 1), jnp.float32)
    for k, w_k in enumerate(weights):                     # K is small & static
        tk = idx[:, k:k + 1]                              # (TB, 1)
        sel = jnp.sum(jnp.where(cls == tk, x, jnp.zeros_like(x)),
                      axis=1, keepdims=True)              # (TB, 1) native
        gathered = gathered + jnp.float32(w_k) * sel.astype(jnp.float32)
    # NOTE: out-of-range label indices (idx < 0 or >= C) contribute
    # w_k * (m + lse) with a zero gathered term; PyTorch's scatter_ would
    # raise instead.  Only relevant if invalid labels can occur.

    w_total = jnp.float32(sum(weights))
    per_row = w_total * (m.astype(jnp.float32) + lse) - gathered   # (TB, 1)

    # Discard padded / out-of-range rows of the last tile with a TRUE SELECT
    # (garbage/Inf/NaN in the unselected branch must not leak -- do not turn
    # this into a multiply-mask).
    row0 = pl.program_id(0) * TB
    row_iota = jax.lax.broadcasted_iota(jnp.int32, (TB, 1), 0)
    per_row = jnp.where(row0 + row_iota < total_b, per_row, 0.0)

    # One partial scalar per grid step, splatted into a lane-dense block
    # (only element [0, 0, 0] is consumed by the wrapper).
    s = jnp.sum(per_row)
    partial_ref[...] = jnp.full((1, 8, 128), s, jnp.float32)


def _vmem_plan():
    """(vmem_limit_bytes or None, in-kernel working-set budget in bytes)."""
    kind = ""
    try:
        kind = jax.devices()[0].device_kind.lower()
    except Exception:
        pass
    if "v7" in kind or "tpu7" in kind:
        # v7x: 64 MiB physical VMEM per TensorCore (32 MiB default scoped).
        return 48 * (1 << 20), 36 * (1 << 20)
    if "v5" in kind or "v6" in kind:
        # v5e/v5p/v6e: 128 MiB physical (16/32 MiB default scoped limits).
        return 96 * (1 << 20), 72 * (1 << 20)
    # Unknown / older generation: leave the compiler's default scoped limit
    # alone and keep the working set comfortably small.
    return None, 10 * (1 << 20)


def _default_tile_rows(C, itemsize, budget_bytes, sublane):
    """Largest batch tile whose live VMEM working set fits the budget.

    Per logit row (lane-padded to 128) the live working set is roughly:
      2 x double-buffered input block (native dtype)
      + ~4 f32-equivalent temporaries ((x-m) f32, exp(x-m) f32,
        the int32 lane-iota, the per-k select result)
    plus slack for the (TB, 1) columns and the int32 target block.
    """
    c_pad = ((max(C, 1) + 127) // 128) * 128
    per_row = c_pad * (2 * itemsize + 4 * 4) + 64
    tb = budget_bytes // per_row
    tb = (tb // sublane) * sublane
    # 4096-row cap keeps per-step DMA granular for pipelining while still
    # amortizing the ~0.35 us per-grid-step overhead and the 4 KiB partial.
    return max(sublane, min(int(tb), 4096))


def softlabel_ce_loss(outputs, targets, weight, *, tb=None):
    """outputs: (B, C) float logits; targets: (K, B) int; weight: length-K list."""
    B, C = outputs.shape
    K = targets.shape[0]
    weights = tuple(float(w) for w in weight)
    assert len(weights) == K, "weight list must have one entry per label set"

    targets_t = jnp.transpose(targets).astype(jnp.int32)   # (B, K)

    itemsize = jnp.dtype(outputs.dtype).itemsize
    sublane = max(8, 32 // max(itemsize, 1))   # 8 f32 / 16 bf16 / 32 int8-fp8
    vmem_limit, budget = _vmem_plan()

    if tb is None:
        tb = _default_tile_rows(C, itemsize, budget, sublane)
    tb = min(int(tb), B)
    if tb < B:
        tb = max(sublane, (tb // sublane) * sublane)   # packed-sublane aligned
    grid_b = pl.cdiv(B, tb)

    cp_kwargs = dict(dimension_semantics=("parallel",))
    if vmem_limit is not None:
        cp_kwargs["vmem_limit_bytes"] = int(vmem_limit)

    cost = pl.CostEstimate(
        flops=int(B) * int(C) * (K + 4),
        transcendentals=int(B) * int(C),
        bytes_accessed=int(B) * int(C) * int(itemsize)
        + int(B) * K * 4
        + grid_b * 8 * 128 * 4,
    )

    partials = pl.pallas_call(
        functools.partial(_softlabel_ce_kernel, weights, B),
        out_shape=jax.ShapeDtypeStruct((grid_b, 8, 128), jnp.float32),
        grid=(grid_b,),
        in_specs=[
            pl.BlockSpec((tb, C), lambda i: (i, 0)),       # logits tile
            pl.BlockSpec((tb, K), lambda i: (i, 0)),       # label-index tile
        ],
        out_specs=pl.BlockSpec((1, 8, 128), lambda i: (i, 0, 0)),
        compiler_params=pltpu.CompilerParams(**cp_kwargs),
        cost_estimate=cost,
    )(outputs, targets_t)

    # Divide by the *global* batch size (not the block-local one).
    return jnp.sum(partials[:, 0, 0]) / jnp.float32(B)


def _reference(outputs, targets, weight):
    """Pure-JAX mirror of the PyTorch forward (f32 math)."""
    B, C = outputs.shape
    logp = jax.nn.log_softmax(outputs.astype(jnp.float32), axis=1)
    tgt = jnp.zeros((B, C), jnp.float32)
    for t, w in zip(targets, weight):
        tgt = tgt + w * jax.nn.one_hot(t, C, dtype=jnp.float32)
    return -jnp.sum(tgt * logp) / B


if __name__ == "__main__":
    key = jax.random.PRNGKey(0)
    k1, k2, k3, k4, k5, k6 = jax.random.split(key, 6)

    # --- Test 1: f32, single-tile path (B fits in one block) ---------------
    B, C, K = 8, 10, 3
    outputs = jax.random.normal(k1, (B, C), dtype=jnp.float32)
    targets = jax.random.randint(k2, (K, B), 0, C, dtype=jnp.int32)
    weight = [0.5, 0.3, 0.2]

    loss = jax.block_until_ready(softlabel_ce_loss(outputs, targets, weight))
    ref = _reference(outputs, targets, weight)
    assert jnp.allclose(loss, ref, rtol=1e-5, atol=1e-5), (loss, ref)

    # --- Test 2: f32, multi-tile grid with remainder-row masking -----------
    B2, C2 = 20, 16
    outputs2 = jax.random.normal(k3, (B2, C2), dtype=jnp.float32)
    targets2 = jax.random.randint(k4, (K, B2), 0, C2, dtype=jnp.int32)

    loss2 = jax.block_until_ready(
        softlabel_ce_loss(outputs2, targets2, weight, tb=8))  # grid=3, pad rows
    ref2 = _reference(outputs2, targets2, weight)
    assert jnp.allclose(loss2, ref2, rtol=1e-5, atol=1e-5), (loss2, ref2)

    # --- Test 3: bf16 fast path (native-dtype max / select, f32 exp) -------
    B3, C3, K3 = 16, 12, 2
    outputs3 = jax.random.normal(k5, (B3, C3), dtype=jnp.bfloat16)
    targets3 = jax.random.randint(k6, (K3, B3), 0, C3, dtype=jnp.int32)
    weight3 = [0.7, 0.3]

    loss3 = jax.block_until_ready(softlabel_ce_loss(outputs3, targets3, weight3))
    ref3 = _reference(outputs3, targets3, weight3)
    assert jnp.allclose(loss3, ref3, rtol=2e-2, atol=3e-2), (loss3, ref3)

    print("KERNEL_OK")
</pallas_src>

<mosaic_0001>
module attributes {stable_mosaic.version = 11 : i64} {
  func.func @_softlabel_ce_kernel(%arg0: i32, %arg1: memref<8x10xf32, #tpu.memory_space<vmem>>, %arg2: memref<8x3xi32, #tpu.memory_space<vmem>>, %arg3: memref<1x8x128xf32, #tpu.memory_space<vmem>>) attributes {dimension_semantics = [#tpu.dimension_semantics<parallel>], iteration_bounds = array<i64: 1>, scalar_prefetch = 0 : i64, scratch_operands = 0 : i64, tpu.core_type = #tpu.core_type<tc>, window_params = [{transform_indices = @transform_0, window_bounds = array<i64: 8, 10>}, {transform_indices = @transform_1, window_bounds = array<i64: 8, 3>}, {transform_indices = @transform_2, window_bounds = array<i64: 1, 8, 128>}]} {
    %c0 = arith.constant 0 : index
    %c0_0 = arith.constant 0 : index
    %0 = vector.load %arg1[%c0, %c0_0] : memref<8x10xf32, #tpu.memory_space<vmem>>, vector<8x10xf32>
    %cst = arith.constant dense<0xFF800000> : vector<8xf32>
    %1 = vector.multi_reduction <maximumf>, %0, %cst [1] : vector<8x10xf32> to vector<8xf32>
    %2 = vector.shape_cast %1 : vector<8xf32> to vector<8x1xf32>
    %3 = vector.broadcast %2 : vector<8x1xf32> to vector<8x10xf32>
    %4 = arith.subf %0, %3 : vector<8x10xf32>
    %5 = math.exp %4 : vector<8x10xf32>
    %cst_1 = arith.constant dense<0.000000e+00> : vector<8xf32>
    %6 = vector.multi_reduction <add>, %5, %cst_1 [1] : vector<8x10xf32> to vector<8xf32>
    %7 = vector.shape_cast %6 : vector<8xf32> to vector<8x1xf32>
    %8 = math.log %7 : vector<8x1xf32>
    %9 = tpu.iota {dimensions = array<i32: 1>} : vector<8x10xi32>
    %c0_2 = arith.constant 0 : index
    %c0_3 = arith.constant 0 : index
    %10 = vector.load %arg2[%c0_2, %c0_3] : memref<8x3xi32, #tpu.memory_space<vmem>>, vector<8x3xi32>
    %cst_4 = arith.constant 0.000000e+00 : f32
    %11 = vector.broadcast %cst_4 : f32 to vector<8x1xf32>
    %12 = vector.extract_strided_slice %10 {offsets = [0, 0], sizes = [8, 1], strides = [1, 1]} : vector<8x3xi32> to vector<8x1xi32>
    %13 = vector.broadcast %12 : vector<8x1xi32> to vector<8x10xi32>
    %14 = arith.cmpi eq, %9, %13 : vector<8x10xi32>
    %cst_5 = arith.constant 0.000000e+00 : f32
    %15 = vector.broadcast %cst_5 : f32 to vector<8x10xf32>
    %16 = arith.select %14, %0, %15 : vector<8x10xi1>, vector<8x10xf32>
    %cst_6 = arith.constant dense<0.000000e+00> : vector<8xf32>
    %17 = vector.multi_reduction <add>, %16, %cst_6 [1] : vector<8x10xf32> to vector<8xf32>
    %18 = vector.shape_cast %17 : vector<8xf32> to vector<8x1xf32>
    %cst_7 = arith.constant 5.000000e-01 : f32
    %19 = vector.broadcast %cst_7 : f32 to vector<8x1xf32>
    %20 = arith.mulf %19, %18 : vector<8x1xf32>
    %21 = arith.addf %11, %20 : vector<8x1xf32>
    %22 = vector.extract_strided_slice %10 {offsets = [0, 1], sizes = [8, 1], strides = [1, 1]} : vector<8x3xi32> to vector<8x1xi32>
    %23 = vector.broadcast %22 : vector<8x1xi32> to vector<8x10xi32>
    %24 = arith.cmpi eq, %9, %23 : vector<8x10xi32>
    %cst_8 = arith.constant 0.000000e+00 : f32
    %25 = vector.broadcast %cst_8 : f32 to vector<8x10xf32>
    %26 = arith.select %24, %0, %25 : vector<8x10xi1>, vector<8x10xf32>
    %cst_9 = arith.constant dense<0.000000e+00> : vector<8xf32>
    %27 = vector.multi_reduction <add>, %26, %cst_9 [1] : vector<8x10xf32> to vector<8xf32>
    %28 = vector.shape_cast %27 : vector<8xf32> to vector<8x1xf32>
    %cst_10 = arith.constant 3.000000e-01 : f32
    %29 = vector.broadcast %cst_10 : f32 to vector<8x1xf32>
    %30 = arith.mulf %29, %28 : vector<8x1xf32>
    %31 = arith.addf %21, %30 : vector<8x1xf32>
    %32 = vector.extract_strided_slice %10 {offsets = [0, 2], sizes = [8, 1], strides = [1, 1]} : vector<8x3xi32> to vector<8x1xi32>
    %33 = vector.broadcast %32 : vector<8x1xi32> to vector<8x10xi32>
    %34 = arith.cmpi eq, %9, %33 : vector<8x10xi32>
    %cst_11 = arith.constant 0.000000e+00 : f32
    %35 = vector.broadcast %cst_11 : f32 to vector<8x10xf32>
    %36 = arith.select %34, %0, %35 : vector<8x10xi1>, vector<8x10xf32>
    %cst_12 = arith.constant dense<0.000000e+00> : vector<8xf32>
    %37 = vector.multi_reduction <add>, %36, %cst_12 [1] : vector<8x10xf32> to vector<8xf32>
    %38 = vector.shape_cast %37 : vector<8xf32> to vector<8x1xf32>
    %cst_13 = arith.constant 2.000000e-01 : f32
    %39 = vector.broadcast %cst_13 : f32 to vector<8x1xf32>
    %40 = arith.mulf %39, %38 : vector<8x1xf32>
    %41 = arith.addf %31, %40 : vector<8x1xf32>
    %42 = arith.addf %2, %8 : vector<8x1xf32>
    %cst_14 = arith.constant 1.000000e+00 : f32
    %43 = vector.broadcast %cst_14 : f32 to vector<8x1xf32>
    %44 = arith.mulf %43, %42 : vector<8x1xf32>
    %45 = arith.subf %44, %41 : vector<8x1xf32>
    %c8_i32 = arith.constant 8 : i32
    %46 = arith.muli %arg0, %c8_i32 : i32
    %47 = tpu.iota {dimensions = array<i32: 0>} : vector<8x1xi32>
    %48 = vector.broadcast %46 : i32 to vector<8x1xi32>
    %49 = arith.addi %48, %47 : vector<8x1xi32>
    %c8_i32_15 = arith.constant 8 : i32
    %50 = vector.broadcast %c8_i32_15 : i32 to vector<8x1xi32>
    %51 = arith.cmpi slt, %49, %50 : vector<8x1xi32>
    %cst_16 = arith.constant 0.000000e+00 : f32
    %52 = vector.broadcast %cst_16 : f32 to vector<8x1xf32>
    %53 = arith.select %51, %45, %52 : vector<8x1xi1>, vector<8x1xf32>
    %54 = vector.shape_cast %53 : vector<8x1xf32> to vector<1x8x1xf32>
    %cst_17 = arith.constant dense<0.000000e+00> : vector<1xf32>
    %55 = vector.multi_reduction <add>, %54, %cst_17 [1, 2] : vector<1x8x1xf32> to vector<1xf32>
    %56 = vector.shape_cast %55 : vector<1xf32> to vector<1x1x1xf32>
    %57 = vector.extract %56[0, 0, 0] : f32 from vector<1x1x1xf32>
    %58 = vector.broadcast %57 : f32 to vector<1x8x128xf32>
    %c0_18 = arith.constant 0 : index
    %c0_19 = arith.constant 0 : index
    %c0_20 = arith.constant 0 : index
    %59 = vector.load %arg3[%c0_18, %c0_19, %c0_20] : memref<1x8x128xf32, #tpu.memory_space<vmem>>, vector<1x8x128xf32>
    tpu.vector_store %arg3[%c0_18, %c0_19, %c0_20], %58 {strides = array<i32>} : memref<1x8x128xf32, #tpu.memory_space<vmem>>, vector<1x8x128xf32>,
    return
  }
  func.func @transform_0(%arg0: i32) -> (i32, i32) {
    %c0_i32 = arith.constant 0 : i32
    %c0_i32_0 = arith.constant 0 : i32
    return %arg0, %c0_i32 : i32, i32
  }
  func.func @transform_1(%arg0: i32) -> (i32, i32) {
    %c0_i32 = arith.constant 0 : i32
    %c0_i32_0 = arith.constant 0 : i32
    return %arg0, %c0_i32 : i32, i32
  }
  func.func @transform_2(%arg0: i32) -> (i32, i32, i32) {
    %c0_i32 = arith.constant 0 : i32
    %c0_i32_0 = arith.constant 0 : i32
    %c0_i32_1 = arith.constant 0 : i32
    return %arg0, %c0_i32, %c0_i32_0 : i32, i32, i32
  }
}

</mosaic_0001>

<bundles_post_ra>
// kernel: tpu_custom_call.1
= control target key start
LH: loop header
LB: loop body
LE: loop exit
PB: predicated region body
PF: predicated region fallthrough
CT: control target
= control target key end

     0   :  { %vm13_vm0 = vcmask 80896   ;;  %v132_v3 = vmov 1   ;;  %v133_v4 = vmov 0   ;;  %s174_s0 = inlined_call_operand.vmem [shape: f32[8,10], index: 0, kind: input, shape index: {}]   ;;  %s175_s1 = inlined_call_operand.vmem [shape: s32[8,3], index: 1, kind: input, shape index: {}]   ;;  %s176_s2 = inlined_call_operand.hbm [shape: f32[1,8,128], index: 2, kind: output, shape index: {}]  }
   0x1   :  { %v12_v0 = vld [vmem:[%s174_s0] sm:$0xff]  ;;  %101 = vset.pattern.permute.xlu1 %v132_v3  ;;  %100 = vset.pattern.permute.xlu0 %v133_v4 }
   0x2   :  { %v27_v1 = vld [vmem:[%s175_s1] sm:$0xff]  ;;  %v14_v2 = vsel %vm13_vm0, %v12_v0, -inf }
   0x3   :  { %7 = vsyncpa [#allocation3], 0  ;;  %15 = vmax.xlane.f32.xlu0 %v14_v2  ;;  %39 = vperm.xlu1 %101, %v27_v1   ;;  %v134_v5 = vmov 2   ;;  %v25_v6 = vlaneseq  ;;  %vm67_vm4 = vcmask 7168   ;;  %s135_s0 = smov [#allocation2]  }
   0x4   :  { %s86_s1 = sshll.u32 %s135_s0, 4  ;;  %s87_s1 = int_to_ptr.vmem [resolvable:$true] %s86_s1 }
   0x5   :  { %v26_v7 = vand.u32 127, %v25_v6  ;;  %s108_s14 = scalar_lea.vmem %s87_s1, 128  ;;  %p113_p1 = scmp.lt.s32.totalorder %s87_s1, %s87_s1 }
   0x6   :  { %p109_p0 = scmp.ne.s32.totalorder %s87_s1, %s108_s14  ;;  %p114_p2 = scmp.lt.s32.totalorder %s108_s14, %s108_s14 }
   0x7   :  { %102 = vset.pattern.permute.xlu1 %v134_v5 }
   0x8   :  { %49 = vperm.xlu1 %102, %v27_v1   ;;  %p115_p3 = por %p114_p2, %p113_p1 }
   0xa   :  { %p116_p4 = pnand %p115_p3, %p109_p0 }
  0x19   :  { %29 = vperm.xlu0 %100, %v27_v1  }
  0x1d   :  { %103 = vset.pattern.permute.xlu0 %v134_v5 }
  0x82   :  { %v40_v8 = vpop.permute.xlu1 %39 }
  0x83   :  { %vm41_vm1 = vcmp.eq.s32.totalorder %v26_v7, %v40_v8 }
  0x84   :  { %v42_v9 = vsel %vm41_vm1, %v12_v0, 0.0 }
  0x85   :  { %v43_v10 = vsel %vm13_vm0, %v42_v9, 0.0 }
  0x86   :  { %44 = vadd.xlane.f32.xlu0 %v43_v10 }
  0x87   :  { %v50_v15 = vpop.permute.xlu1 %49 }
  0x88   :  { %vm51_vm3 = vcmp.eq.s32.totalorder %v26_v7, %v50_v15 }
  0x89   :  { %v52_v20 = vsel %vm51_vm3, %v12_v0, 0.0 }
  0x8a   :  { %v53_v21 = vsel %vm13_vm0, %v52_v20, 0.0 }
  0x90   :  { %v16_v11 = vpop.xlane.xlu0 %15 }
  0x91   :  { %v17_v12 = vsub.f32 %v12_v0, %v16_v11 }
  0x93   :  { %v18_v13 = vmul.f32 1.442695, %v17_v12 }
  0x95   :  { %104 = vpow2.f32 %v18_v13 }
  0x98   :  { %v30_v14 = vpop.permute.xlu0 %29 }
  0x99   :  { %vm31_vm2 = vcmp.eq.s32.totalorder %v26_v7, %v30_v14 }
  0x9a   :  { %v32_v17 = vsel %vm31_vm2, %v12_v0, 0.0 }
  0x9b   :  { %v33_v19 = vsel %vm13_vm0, %v32_v17, 0.0 }
  0x9f   :  { %v105_v16 = vpop.eup %104 }
  0xa0   :  { %v20_v18 = vsel %vm13_vm0, %v105_v16, 0.0 }
  0xa1   :  { %21 = vadd.xlane.f32.xlu1 %v20_v18 }
  0xa5   :  { %34 = vadd.xlane.f32.xlu1 %v33_v19 }
  0xa9   :  { %54 = vadd.xlane.f32.xlu1 %v53_v21 }
 0x113   :  { %v45_v23 = vpop.xlane.xlu0 %44 }
 0x114   :  { %v46_v26 = vmul.f32 0.3, %v45_v23 }
 0x12e   :  { %v22_v22 = vpop.xlane.xlu1 %21 }
 0x12f   :  { %106 = vlog2.f32 %v22_v22 }
 0x132   :  { %v35_v24 = vpop.xlane.xlu1 %34 }
 0x133   :  { %v36_v25 = vmul.f32 0.5, %v35_v24 }
 0x135   :  { %v47_v28 = vadd.f32 %v46_v26, %v36_v25 }
 0x136   :  { %v55_v27 = vpop.xlane.xlu1 %54 }
 0x137   :  { %v56_v29 = vmul.f32 0.2, %v55_v27 }
 0x139   :  { %v107_v30 = vpop.eup %106  ;;  %v57_v32 = vadd.f32 %v56_v29, %v47_v28 }
 0x13a   :  { %v24_v31 = vmul.f32 0.6931472, %v107_v30 }
 0x13c   :  { %v58_v33 = vadd.f32 %v24_v31, %v16_v11 }
 0x13e   :  { %v59_v34 = vsub.f32 %v58_v33, %v57_v32 }
 0x140   :  { %v68_v35 = vsel %vm67_vm4, %v59_v34, 0.0 }
 0x141   :  { %69 = vadd.xlane.f32.xlu1 %v68_v35 }
 0x1ce   :  { %v70_v36 = vpop.xlane.xlu1 %69 }
 0x1cf   :  { %v71_v37 = vrot.slane %v70_v36, 4 }
 0x1d1   :  { %v72_v38 = vadd.f32 %v71_v37, %v70_v36 }
 0x1d3   :  { %v73_v39 = vrot.slane %v72_v38, 2 }
 0x1d5   :  { %v74_v40 = vadd.f32 %v73_v39, %v72_v38 }
 0x1d7   :  { %v75_v41 = vrot.slane %v74_v40, 1 }
 0x1d9   :  { %v76_v42 = vadd.f32 %v75_v41, %v74_v40 }
 0x1db   :  { %94 = vpush %v76_v42 }
 0x20c   :  { %s95_s13 = spop %94 }
 0x20d   :  { %v78_v43 = vstv %s95_s13 }
 0x20e   :  { %79 = vst [vmem:[#allocation2] sm:$0xff] %v78_v43 }
 0x20f   :  { %119 = shalt.err (!%p116_p4)
}
 0x210   :  { %s120_s17 = scalar_lea.hbm %s176_s2, 128 }
 0x211   :  { %p121_p5 = scmp.ne.s32.totalorder %s176_s2, %s120_s17  ;;  %p124_p6 = scmp.lt.u32.totalorder %s120_s17, %s176_s2 }
 0x213   :  { %p126_p7 = pnand %p124_p6, %p121_p5 }
 0x215   :  { %129 = shalt.err (!%p126_p7)
}
 0x216   :  { %89 = dma.vmem_to_hbm [thread:$0]  %s87_s1, 128, %s176_s2, [#allocation3]  }
 0x217   :  { %130 = dma.done.wait [#allocation3], 128  }
 0x218   :  { %131 = vsyncadd [#allocation3], 4294967168 }
 0x219   :  { %93 = vsyncpa [#allocation3], 1 }

</bundles_post_ra>
